<compile_context>
chip_gen: v5e
topology: v5e:2x2
jax: 0.10.0
libtpu: 0.0.40
codegen_flags: <defaults>
</compile_context>

<pallas_src>
import functools

import jax
import jax.numpy as jnp
from jax.experimental import pallas as pl
from jax.experimental.pallas import tpu as pltpu


def _fast_recip(d):
    """Approx EUP reciprocal refined with one Newton-Raphson step (pure VPU ops).

    Relative error ~eps^2 of the raw vrcp approximation -- plenty for f32 loss math --
    while keeping a heavy divide off the single EUP slot.
    """
    r = pl.reciprocal(d, approx=True)
    return r * (2.0 - d * r)


def _hybrid_cappa_kernel(x_ref, t_ref, ha_ref, hb_ref, nom_ref, foc_ref, *,
                         n_valid, tiles_per_slice, need_mask, y_pow, gamma, eps):
    s = pl.program_id(0)          # batch slice (parallel; one per TensorCore on v7x)
    i = pl.program_id(1)          # tile within slice (arbitrary; accumulation axis)

    @pl.when(i == 0)
    def _init():
        ha_ref[...] = jnp.zeros_like(ha_ref)
        hb_ref[...] = jnp.zeros_like(hb_ref)
        nom_ref[...] = jnp.zeros_like(nom_ref)
        foc_ref[...] = jnp.zeros_like(foc_ref)

    x = x_ref[...].astype(jnp.float32)        # (C, TB) logits, classes on sublanes
    t = t_ref[...]                            # (1, TB) int32 class ids
    C, TB = x.shape

    cls = jax.lax.broadcasted_iota(jnp.int32, (C, TB), 0)        # class id per row
    is_tgt = cls == t                                            # (C, TB) bool (reused)

    if need_mask:
        # Unclamped global tile index: fully out-of-range (clamped duplicate) tiles get
        # valid == False everywhere and contribute nothing.
        g = s * tiles_per_slice + i
        col = jax.lax.broadcasted_iota(jnp.int32, (1, TB), 1) + g * TB
        valid_b = col < n_valid                                  # (1, TB) bool
        valid_f = valid_b.astype(jnp.float32)
        # Mask logits BEFORE exp/log1p so garbage OOB lanes never produce Inf/NaN.
        x = jnp.where(valid_b, x, 0.0)
        onehot = jnp.where(is_tgt, valid_f, 0.0)                 # one-hot * valid
    else:
        onehot = jnp.where(is_tgt, 1.0, 0.0)

    # ---- sigmoid focal term: sum over classes and batch (mean-over-B applied later) ---
    e = jnp.exp(-jnp.abs(x))
    x_tgt = jnp.where(is_tgt, x, 0.0)                            # x * onehot, one select
    logpt = x_tgt - jnp.maximum(x, 0.0) - jnp.log1p(e)           # = -BCE_with_logits
    # pt = exp(logpt) without a second exp: pt = num / (1 + e), where num = 1 when
    # sign(x) matches the binary target and exp(-|x|) otherwise.
    pos = x >= 0.0
    num = jnp.where(is_tgt, jnp.where(pos, 1.0, e), jnp.where(pos, e, 1.0))
    pt = num * _fast_recip(1.0 + e)
    omt = 1.0 - pt
    if float(gamma) == float(int(gamma)):     # PyTorch module hard-codes gamma = 2
        focal_term = omt ** int(gamma)        # integer_pow -> VPU multiplies
    else:
        focal_term = omt ** jnp.float32(gamma)
    focal = -(focal_term * logpt)
    if need_mask:
        focal = focal * valid_f
    foc_ref[...] += jnp.sum(focal, axis=1, keepdims=True)        # (C, 1)

    # ---- quadratic-kappa statistics on softmax probabilities --------------------------
    m = jnp.max(x, axis=0, keepdims=True)                        # class-axis max
    ex = jnp.exp(x - m)
    # Approx EUP reciprocal: its per-column scale error cancels exactly when pred is
    # renormalized below, so it is numerically free here.
    y = ex * pl.reciprocal(jnp.sum(ex, axis=0, keepdims=True), approx=True)

    if float(y_pow) == float(int(y_pow)):
        pred = y ** int(y_pow)                # integer_pow -> VPU multiplies
    else:
        pred = y ** jnp.float32(y_pow)
    # Approx reciprocal + one NR step: the error here would NOT cancel between nom and
    # denom, so refine to ~f32 accuracy while staying off the divide path.
    pred_norm = pred * _fast_recip(eps + jnp.sum(pred, axis=0, keepdims=True))
    if need_mask:
        pred_norm = pred_norm * valid_f

    ha_ref[...] += jnp.sum(pred_norm, axis=1, keepdims=True)     # hist_rater_a (C,1)
    hb_ref[...] += jnp.sum(onehot, axis=1, keepdims=True)        # hist_rater_b (C,1)
    # nom = sum_{c,b} (c - t_b)^2 * pred_norm[c,b]; the (i-j)^2 weight is applied
    # elementwise so the transposed (B-contraction) matmul is never formed.
    d = (cls - t).astype(jnp.float32)
    nom_ref[...] += jnp.sum(pred_norm * (d * d), axis=1, keepdims=True)


def hybrid_cappa_loss_cb(logits_cb, target, *, y_pow=2, log_scale=1.0, eps=1e-15,
                         gamma=2.0, block_b=32768, num_slices=2):
    """HybridCappaLoss forward on class-major logits of shape (C, B).

    This is the fast entry point (no relayout).  ``num_slices=2`` splits the batch over
    a leading "parallel" grid axis so both v7x TensorCores are used; on v5e/v6e the
    extra axis simply runs serially.  The PyTorch module hard-codes ``gamma = 2``, so
    leave ``gamma=2.0`` to match it exactly.
    """
    C, B = logits_cb.shape
    t_row = target.reshape(1, B).astype(jnp.int32)

    lane = 128
    b_rounded = pl.cdiv(B, lane) * lane
    tb = min(pl.cdiv(block_b, lane) * lane, b_rounded)
    if tb >= B:
        tb = B                                # single tile == full array (no OOB lanes)
    total_tiles = pl.cdiv(B, tb)
    num_slices = max(1, min(num_slices, total_tiles))
    tps = pl.cdiv(total_tiles, num_slices)
    # Masking needed iff any tile contains lanes past B (ragged last tile and/or
    # clamped duplicate tiles when total_tiles does not divide evenly by num_slices).
    need_mask = (num_slices * tps * tb != B)

    last = total_tiles - 1

    def batch_block(s, i):
        g = s * tps + i
        return jnp.minimum(g, last) if need_mask else g

    kernel = functools.partial(
        _hybrid_cappa_kernel, n_valid=B, tiles_per_slice=tps, need_mask=need_mask,
        y_pow=y_pow, gamma=gamma, eps=eps)

    acc_shape = jax.ShapeDtypeStruct((num_slices, C, 1), jnp.float32)
    acc_spec = pl.BlockSpec((None, C, 1), lambda s, i: (s, 0, 0))

    # TODO(synk): ignore_index masking (data-dependent compaction) and the empty-target
    #             early-return are not implemented (default ignore_index=None path only).
    ha, hb, nomv, foc = pl.pallas_call(
        kernel,
        out_shape=(acc_shape, acc_shape, acc_shape, acc_shape),
        grid=(num_slices, tps),
        in_specs=[pl.BlockSpec((C, tb), lambda s, i: (0, batch_block(s, i))),
                  pl.BlockSpec((1, tb), lambda s, i: (0, batch_block(s, i)))],
        out_specs=(acc_spec, acc_spec, acc_spec, acc_spec),
        compiler_params=pltpu.CompilerParams(
            dimension_semantics=("parallel", "arbitrary"),
            vmem_limit_bytes=32 * 1024 * 1024),
    )(logits_cb, t_row)

    # ---- tiny finalize (a handful of scalar flops) in plain JAX -----------------------
    ha = jnp.sum(ha, axis=(0, 2))             # (C,)
    hb = jnp.sum(hb, axis=(0, 2))             # (C,)
    nom = jnp.sum(nomv)
    foc = jnp.sum(foc)

    idx = jnp.arange(C, dtype=jnp.float32)
    inv_w = 1.0 / float((C - 1) ** 2)
    inv_b = 1.0 / float(B)
    a0, a1, a2 = jnp.sum(ha), jnp.sum(idx * ha), jnp.sum(idx * idx * ha)
    b0, b1, b2 = jnp.sum(hb), jnp.sum(idx * hb), jnp.sum(idx * idx * hb)
    # sum_{i,j} (i-j)^2 ha_i hb_j = A2*B0 - 2*A1*B1 + A0*B2 (histogram moments),
    # replacing the K=1 outer product + (C,C) weight multiply.
    denom = (a2 * b0 - 2.0 * a1 * b1 + a0 * b2) * inv_w * inv_b
    nom = nom * inv_w
    kappa_loss = 1.0 + (-(1.0 - nom / (denom + eps)))
    focal_loss = foc * inv_b
    return kappa_loss + jnp.float32(log_scale) * focal_loss


def hybrid_cappa_loss(logits, target, **kwargs):
    """PyTorch-layout entry point: logits (B, C), integer targets (B,).

    Note: the (B, C) -> (C, B) relayout below is a separate full-HBM-pass XLA op; for
    large B prefer having the producer emit class-major logits (e.g. transpose the final
    projection) and call ``hybrid_cappa_loss_cb`` directly.
    """
    return hybrid_cappa_loss_cb(jnp.transpose(logits), target, **kwargs)


def _reference(logits, target, *, y_pow=2, log_scale=1.0, eps=1e-15):
    """Pure-JAX mirror of the PyTorch forward (gamma hard-coded to 2)."""
    B, C = logits.shape
    x = logits.astype(jnp.float32)
    onehot = jax.nn.one_hot(target, C, dtype=jnp.float32)
    bce = jnp.maximum(x, 0.0) - x * onehot + jnp.log1p(jnp.exp(-jnp.abs(x)))
    logpt = -bce
    pt = jnp.exp(logpt)
    focal = -((1.0 - pt) ** 2) * logpt
    focal_loss = jnp.sum(jnp.mean(focal, axis=0))
    y = jax.nn.softmax(x, axis=1)
    pred = y ** y_pow
    pred_norm = pred / (eps + jnp.sum(pred, axis=1, keepdims=True))
    hist_a = jnp.sum(pred_norm, axis=0)
    hist_b = jnp.sum(onehot, axis=0)
    conf = pred_norm.T @ onehot
    idx = jnp.arange(C, dtype=jnp.float32)
    w = (idx[:, None] - idx[None, :]) ** 2 / float((C - 1) ** 2)
    nom = jnp.sum(w * conf)
    denom = jnp.sum(w * jnp.outer(hist_a, hist_b) / B)
    kappa_loss = 1.0 + (-(1.0 - nom / (denom + eps)))
    return kappa_loss + log_scale * focal_loss


if __name__ == "__main__":
    key = jax.random.PRNGKey(0)
    k1, k2, k3, k4, k5, k6 = jax.random.split(key, 6)

    # 1) Tiny batch: single tile equal to the full array (mask path compiled out).
    B1, C1 = 8, 5
    logits1 = jax.random.normal(k1, (B1, C1), dtype=jnp.float32)
    target1 = jax.random.randint(k2, (B1,), 0, C1, dtype=jnp.int32)
    out1 = jax.block_until_ready(hybrid_cappa_loss(logits1, target1))
    ref1 = jax.block_until_ready(_reference(logits1, target1))
    assert jnp.allclose(out1, ref1, rtol=1e-4, atol=1e-4), (out1, ref1)

    # 2) Ragged multi-tile: grid (2 slices x 2 tiles), last tile partial plus one clamped
    #    duplicate tile -> exercises the in-kernel masking path (no jnp.pad anywhere).
    B2, C2 = 300, 5
    logits2 = jax.random.normal(k3, (B2, C2), dtype=jnp.float32)
    target2 = jax.random.randint(k4, (B2,), 0, C2, dtype=jnp.int32)
    out2 = jax.block_until_ready(
        hybrid_cappa_loss(logits2, target2, block_b=128, num_slices=2))
    ref2 = jax.block_until_ready(_reference(logits2, target2))
    assert jnp.allclose(out2, ref2, rtol=1e-4, atol=1e-4), (out2, ref2)

    # 3) Aligned multi-tile with 2 parallel slices (2 tiles each), mask compiled out.
    B3, C3 = 512, 5
    logits3 = jax.random.normal(k5, (B3, C3), dtype=jnp.float32)
    target3 = jax.random.randint(k6, (B3,), 0, C3, dtype=jnp.int32)
    out3 = jax.block_until_ready(
        hybrid_cappa_loss(logits3, target3, block_b=128, num_slices=2))
    ref3 = jax.block_until_ready(_reference(logits3, target3))
    assert jnp.allclose(out3, ref3, rtol=1e-4, atol=1e-4), (out3, ref3)

    print("KERNEL_OK")
</pallas_src>

<mosaic_0001>
module attributes {stable_mosaic.version = 11 : i64} {
  func.func @_hybrid_cappa_kernel(%arg0: i32, %arg1: i32, %arg2: memref<5x8xf32, #tpu.memory_space<vmem>>, %arg3: memref<1x8xi32, #tpu.memory_space<vmem>>, %arg4: memref<1x5x1xf32, #tpu.memory_space<vmem>>, %arg5: memref<1x5x1xf32, #tpu.memory_space<vmem>>, %arg6: memref<1x5x1xf32, #tpu.memory_space<vmem>>, %arg7: memref<1x5x1xf32, #tpu.memory_space<vmem>>) attributes {dimension_semantics = [#tpu.dimension_semantics<parallel>, #tpu.dimension_semantics<arbitrary>], iteration_bounds = array<i64: 1, 1>, scalar_prefetch = 0 : i64, scratch_operands = 0 : i64, tpu.core_type = #tpu.core_type<tc>, window_params = [{transform_indices = @transform_0, window_bounds = array<i64: 5, 8>}, {transform_indices = @transform_1, window_bounds = array<i64: 1, 8>}, {transform_indices = @transform_2, window_bounds = array<i64: 1, 5, 1>}, {transform_indices = @transform_3, window_bounds = array<i64: 1, 5, 1>}, {transform_indices = @transform_4, window_bounds = array<i64: 1, 5, 1>}, {transform_indices = @transform_5, window_bounds = array<i64: 1, 5, 1>}]} {
    %c0_i32 = arith.constant 0 : i32
    %0 = arith.cmpi eq, %arg1, %c0_i32 : i32
    %1 = arith.extui %0 : i1 to i32
    %c0_i32_0 = arith.constant 0 : i32
    %2 = arith.cmpi ne, %1, %c0_i32_0 : i32
    scf.if %2 {
      %cst_48 = arith.constant 0.000000e+00 : f32
      %102 = vector.broadcast %cst_48 : f32 to vector<5x1xf32>
      %c0_49 = arith.constant 0 : index
      %c0_50 = arith.constant 0 : index
      %c0_51 = arith.constant 0 : index
      %103 = vector.load %arg4[%c0_49, %c0_50, %c0_51] : memref<1x5x1xf32, #tpu.memory_space<vmem>>, vector<1x5x1xf32>
      %104 = vector.shape_cast %103 : vector<1x5x1xf32> to vector<5x1xf32>
      %105 = vector.shape_cast %102 : vector<5x1xf32> to vector<1x5x1xf32>
      tpu.vector_store %arg4[%c0_49, %c0_50, %c0_51], %105 {strides = array<i32>} : memref<1x5x1xf32, #tpu.memory_space<vmem>>, vector<1x5x1xf32>,
      %cst_52 = arith.constant 0.000000e+00 : f32
      %106 = vector.broadcast %cst_52 : f32 to vector<5x1xf32>
      %c0_53 = arith.constant 0 : index
      %c0_54 = arith.constant 0 : index
      %c0_55 = arith.constant 0 : index
      %107 = vector.load %arg5[%c0_53, %c0_54, %c0_55] : memref<1x5x1xf32, #tpu.memory_space<vmem>>, vector<1x5x1xf32>
      %108 = vector.shape_cast %107 : vector<1x5x1xf32> to vector<5x1xf32>
      %109 = vector.shape_cast %106 : vector<5x1xf32> to vector<1x5x1xf32>
      tpu.vector_store %arg5[%c0_53, %c0_54, %c0_55], %109 {strides = array<i32>} : memref<1x5x1xf32, #tpu.memory_space<vmem>>, vector<1x5x1xf32>,
      %cst_56 = arith.constant 0.000000e+00 : f32
      %110 = vector.broadcast %cst_56 : f32 to vector<5x1xf32>
      %c0_57 = arith.constant 0 : index
      %c0_58 = arith.constant 0 : index
      %c0_59 = arith.constant 0 : index
      %111 = vector.load %arg6[%c0_57, %c0_58, %c0_59] : memref<1x5x1xf32, #tpu.memory_space<vmem>>, vector<1x5x1xf32>
      %112 = vector.shape_cast %111 : vector<1x5x1xf32> to vector<5x1xf32>
      %113 = vector.shape_cast %110 : vector<5x1xf32> to vector<1x5x1xf32>
      tpu.vector_store %arg6[%c0_57, %c0_58, %c0_59], %113 {strides = array<i32>} : memref<1x5x1xf32, #tpu.memory_space<vmem>>, vector<1x5x1xf32>,
      %cst_60 = arith.constant 0.000000e+00 : f32
      %114 = vector.broadcast %cst_60 : f32 to vector<5x1xf32>
      %c0_61 = arith.constant 0 : index
      %c0_62 = arith.constant 0 : index
      %c0_63 = arith.constant 0 : index
      %115 = vector.load %arg7[%c0_61, %c0_62, %c0_63] : memref<1x5x1xf32, #tpu.memory_space<vmem>>, vector<1x5x1xf32>
      %116 = vector.shape_cast %115 : vector<1x5x1xf32> to vector<5x1xf32>
      %117 = vector.shape_cast %114 : vector<5x1xf32> to vector<1x5x1xf32>
      tpu.vector_store %arg7[%c0_61, %c0_62, %c0_63], %117 {strides = array<i32>} : memref<1x5x1xf32, #tpu.memory_space<vmem>>, vector<1x5x1xf32>,
    } else {
    }
    %c0 = arith.constant 0 : index
    %c0_1 = arith.constant 0 : index
    %3 = vector.load %arg2[%c0, %c0_1] : memref<5x8xf32, #tpu.memory_space<vmem>>, vector<5x8xf32>
    %c0_2 = arith.constant 0 : index
    %c0_3 = arith.constant 0 : index
    %4 = vector.load %arg3[%c0_2, %c0_3] : memref<1x8xi32, #tpu.memory_space<vmem>>, vector<1x8xi32>
    %5 = tpu.iota {dimensions = array<i32: 0>} : vector<5x8xi32>
    %6 = vector.broadcast %4 : vector<1x8xi32> to vector<5x8xi32>
    %7 = arith.cmpi eq, %5, %6 : vector<5x8xi32>
    %cst = arith.constant 1.000000e+00 : f32
    %cst_4 = arith.constant 0.000000e+00 : f32
    %8 = vector.broadcast %cst : f32 to vector<5x8xf32>
    %9 = vector.broadcast %cst_4 : f32 to vector<5x8xf32>
    %10 = arith.select %7, %8, %9 : vector<5x8xi1>, vector<5x8xf32>
    %11 = math.absf %3 : vector<5x8xf32>
    %cst_5 = arith.constant 0.000000e+00 : f32
    %12 = vector.broadcast %cst_5 : f32 to vector<5x8xf32>
    %13 = arith.subf %12, %11 : vector<5x8xf32>
    %14 = math.exp %13 : vector<5x8xf32>
    %cst_6 = arith.constant 0.000000e+00 : f32
    %15 = vector.broadcast %cst_6 : f32 to vector<5x8xf32>
    %16 = arith.select %7, %3, %15 : vector<5x8xi1>, vector<5x8xf32>
    %cst_7 = arith.constant 0.000000e+00 : f32
    %17 = vector.broadcast %cst_7 : f32 to vector<5x8xf32>
    %18 = arith.maximumf %3, %17 : vector<5x8xf32>
    %19 = arith.subf %16, %18 : vector<5x8xf32>
    %20 = math.log1p %14 : vector<5x8xf32>
    %21 = arith.subf %19, %20 : vector<5x8xf32>
    %cst_8 = arith.constant 0.000000e+00 : f32
    %22 = vector.broadcast %cst_8 : f32 to vector<5x8xf32>
    %23 = arith.cmpf oge, %3, %22 : vector<5x8xf32>
    %cst_9 = arith.constant 1.000000e+00 : f32
    %24 = vector.broadcast %cst_9 : f32 to vector<5x8xf32>
    %25 = arith.select %23, %24, %14 : vector<5x8xi1>, vector<5x8xf32>
    %cst_10 = arith.constant 1.000000e+00 : f32
    %26 = vector.broadcast %cst_10 : f32 to vector<5x8xf32>
    %27 = arith.select %23, %14, %26 : vector<5x8xi1>, vector<5x8xf32>
    %28 = arith.select %7, %25, %27 : vector<5x8xi1>, vector<5x8xf32>
    %cst_11 = arith.constant 1.000000e+00 : f32
    %29 = vector.broadcast %cst_11 : f32 to vector<5x8xf32>
    %30 = arith.addf %29, %14 : vector<5x8xf32>
    %31 = tpu.reciprocal %30 {approx = true} : vector<5x8xf32> -> vector<5x8xf32>
    %32 = arith.mulf %30, %31 : vector<5x8xf32>
    %cst_12 = arith.constant 2.000000e+00 : f32
    %33 = vector.broadcast %cst_12 : f32 to vector<5x8xf32>
    %34 = arith.subf %33, %32 : vector<5x8xf32>
    %35 = arith.mulf %31, %34 : vector<5x8xf32>
    %36 = arith.mulf %28, %35 : vector<5x8xf32>
    %cst_13 = arith.constant 1.000000e+00 : f32
    %37 = vector.broadcast %cst_13 : f32 to vector<5x8xf32>
    %38 = arith.subf %37, %36 : vector<5x8xf32>
    %39 = arith.mulf %38, %38 : vector<5x8xf32>
    %40 = arith.mulf %39, %21 : vector<5x8xf32>
    %cst_14 = arith.constant 0.000000e+00 : f32
    %41 = vector.broadcast %cst_14 : f32 to vector<5x8xf32>
    %42 = arith.subf %41, %40 : vector<5x8xf32>
    %c0_15 = arith.constant 0 : index
    %c0_16 = arith.constant 0 : index
    %c0_17 = arith.constant 0 : index
    %43 = vector.load %arg7[%c0_15, %c0_16, %c0_17] : memref<1x5x1xf32, #tpu.memory_space<vmem>>, vector<1x5x1xf32>
    %44 = vector.shape_cast %43 : vector<1x5x1xf32> to vector<5x1xf32>
    %cst_18 = arith.constant dense<0.000000e+00> : vector<5xf32>
    %45 = vector.multi_reduction <add>, %42, %cst_18 [1] : vector<5x8xf32> to vector<5xf32>
    %46 = vector.shape_cast %45 : vector<5xf32> to vector<5x1xf32>
    %47 = arith.addf %44, %46 : vector<5x1xf32>
    %c0_19 = arith.constant 0 : index
    %c0_20 = arith.constant 0 : index
    %c0_21 = arith.constant 0 : index
    %48 = vector.load %arg7[%c0_19, %c0_20, %c0_21] : memref<1x5x1xf32, #tpu.memory_space<vmem>>, vector<1x5x1xf32>
    %49 = vector.shape_cast %48 : vector<1x5x1xf32> to vector<5x1xf32>
    %50 = vector.shape_cast %47 : vector<5x1xf32> to vector<1x5x1xf32>
    tpu.vector_store %arg7[%c0_19, %c0_20, %c0_21], %50 {strides = array<i32>} : memref<1x5x1xf32, #tpu.memory_space<vmem>>, vector<1x5x1xf32>,
    %cst_22 = arith.constant dense<0xFF800000> : vector<8xf32>
    %51 = vector.multi_reduction <maximumf>, %3, %cst_22 [0] : vector<5x8xf32> to vector<8xf32>
    %52 = vector.shape_cast %51 : vector<8xf32> to vector<1x8xf32>
    %53 = vector.broadcast %52 : vector<1x8xf32> to vector<5x8xf32>
    %54 = arith.subf %3, %53 : vector<5x8xf32>
    %55 = math.exp %54 : vector<5x8xf32>
    %cst_23 = arith.constant dense<0.000000e+00> : vector<8xf32>
    %56 = vector.multi_reduction <add>, %55, %cst_23 [0] : vector<5x8xf32> to vector<8xf32>
    %57 = vector.shape_cast %56 : vector<8xf32> to vector<1x8xf32>
    %58 = tpu.reciprocal %57 {approx = true} : vector<1x8xf32> -> vector<1x8xf32>
    %59 = vector.broadcast %58 : vector<1x8xf32> to vector<5x8xf32>
    %60 = arith.mulf %55, %59 : vector<5x8xf32>
    %61 = arith.mulf %60, %60 : vector<5x8xf32>
    %cst_24 = arith.constant dense<0.000000e+00> : vector<8xf32>
    %62 = vector.multi_reduction <add>, %61, %cst_24 [0] : vector<5x8xf32> to vector<8xf32>
    %63 = vector.shape_cast %62 : vector<8xf32> to vector<1x8xf32>
    %cst_25 = arith.constant 1.000000e-15 : f32
    %64 = vector.broadcast %cst_25 : f32 to vector<1x8xf32>
    %65 = arith.addf %64, %63 : vector<1x8xf32>
    %66 = tpu.reciprocal %65 {approx = true} : vector<1x8xf32> -> vector<1x8xf32>
    %67 = arith.mulf %65, %66 : vector<1x8xf32>
    %cst_26 = arith.constant 2.000000e+00 : f32
    %68 = vector.broadcast %cst_26 : f32 to vector<1x8xf32>
    %69 = arith.subf %68, %67 : vector<1x8xf32>
    %70 = arith.mulf %66, %69 : vector<1x8xf32>
    %71 = vector.broadcast %70 : vector<1x8xf32> to vector<5x8xf32>
    %72 = arith.mulf %61, %71 : vector<5x8xf32>
    %c0_27 = arith.constant 0 : index
    %c0_28 = arith.constant 0 : index
    %c0_29 = arith.constant 0 : index
    %73 = vector.load %arg4[%c0_27, %c0_28, %c0_29] : memref<1x5x1xf32, #tpu.memory_space<vmem>>, vector<1x5x1xf32>
    %74 = vector.shape_cast %73 : vector<1x5x1xf32> to vector<5x1xf32>
    %cst_30 = arith.constant dense<0.000000e+00> : vector<5xf32>
    %75 = vector.multi_reduction <add>, %72, %cst_30 [1] : vector<5x8xf32> to vector<5xf32>
    %76 = vector.shape_cast %75 : vector<5xf32> to vector<5x1xf32>
    %77 = arith.addf %74, %76 : vector<5x1xf32>
    %c0_31 = arith.constant 0 : index
    %c0_32 = arith.constant 0 : index
    %c0_33 = arith.constant 0 : index
    %78 = vector.load %arg4[%c0_31, %c0_32, %c0_33] : memref<1x5x1xf32, #tpu.memory_space<vmem>>, vector<1x5x1xf32>
    %79 = vector.shape_cast %78 : vector<1x5x1xf32> to vector<5x1xf32>
    %80 = vector.shape_cast %77 : vector<5x1xf32> to vector<1x5x1xf32>
    tpu.vector_store %arg4[%c0_31, %c0_32, %c0_33], %80 {strides = array<i32>} : memref<1x5x1xf32, #tpu.memory_space<vmem>>, vector<1x5x1xf32>,
    %c0_34 = arith.constant 0 : index
    %c0_35 = arith.constant 0 : index
    %c0_36 = arith.constant 0 : index
    %81 = vector.load %arg5[%c0_34, %c0_35, %c0_36] : memref<1x5x1xf32, #tpu.memory_space<vmem>>, vector<1x5x1xf32>
    %82 = vector.shape_cast %81 : vector<1x5x1xf32> to vector<5x1xf32>
    %cst_37 = arith.constant dense<0.000000e+00> : vector<5xf32>
    %83 = vector.multi_reduction <add>, %10, %cst_37 [1] : vector<5x8xf32> to vector<5xf32>
    %84 = vector.shape_cast %83 : vector<5xf32> to vector<5x1xf32>
    %85 = arith.addf %82, %84 : vector<5x1xf32>
    %c0_38 = arith.constant 0 : index
    %c0_39 = arith.constant 0 : index
    %c0_40 = arith.constant 0 : index
    %86 = vector.load %arg5[%c0_38, %c0_39, %c0_40] : memref<1x5x1xf32, #tpu.memory_space<vmem>>, vector<1x5x1xf32>
    %87 = vector.shape_cast %86 : vector<1x5x1xf32> to vector<5x1xf32>
    %88 = vector.shape_cast %85 : vector<5x1xf32> to vector<1x5x1xf32>
    tpu.vector_store %arg5[%c0_38, %c0_39, %c0_40], %88 {strides = array<i32>} : memref<1x5x1xf32, #tpu.memory_space<vmem>>, vector<1x5x1xf32>,
    %89 = vector.broadcast %4 : vector<1x8xi32> to vector<5x8xi32>
    %90 = arith.subi %5, %89 : vector<5x8xi32>
    %91 = arith.sitofp %90 : vector<5x8xi32> to vector<5x8xf32>
    %c0_41 = arith.constant 0 : index
    %c0_42 = arith.constant 0 : index
    %c0_43 = arith.constant 0 : index
    %92 = vector.load %arg6[%c0_41, %c0_42, %c0_43] : memref<1x5x1xf32, #tpu.memory_space<vmem>>, vector<1x5x1xf32>
    %93 = vector.shape_cast %92 : vector<1x5x1xf32> to vector<5x1xf32>
    %94 = arith.mulf %91, %91 : vector<5x8xf32>
    %95 = arith.mulf %72, %94 : vector<5x8xf32>
    %cst_44 = arith.constant dense<0.000000e+00> : vector<5xf32>
    %96 = vector.multi_reduction <add>, %95, %cst_44 [1] : vector<5x8xf32> to vector<5xf32>
    %97 = vector.shape_cast %96 : vector<5xf32> to vector<5x1xf32>
    %98 = arith.addf %93, %97 : vector<5x1xf32>
    %c0_45 = arith.constant 0 : index
    %c0_46 = arith.constant 0 : index
    %c0_47 = arith.constant 0 : index
    %99 = vector.load %arg6[%c0_45, %c0_46, %c0_47] : memref<1x5x1xf32, #tpu.memory_space<vmem>>, vector<1x5x1xf32>
    %100 = vector.shape_cast %99 : vector<1x5x1xf32> to vector<5x1xf32>
    %101 = vector.shape_cast %98 : vector<5x1xf32> to vector<1x5x1xf32>
    tpu.vector_store %arg6[%c0_45, %c0_46, %c0_47], %101 {strides = array<i32>} : memref<1x5x1xf32, #tpu.memory_space<vmem>>, vector<1x5x1xf32>,
    return
  }
  func.func @transform_0(%arg0: i32, %arg1: i32) -> (i32, i32) {
    %c1_i32 = arith.constant 1 : i32
    %0 = arith.muli %arg0, %c1_i32 : i32
    %1 = arith.addi %0, %arg1 : i32
    %c0_i32 = arith.constant 0 : i32
    %c0_i32_0 = arith.constant 0 : i32
    return %c0_i32, %1 : i32, i32
  }
  func.func @transform_1(%arg0: i32, %arg1: i32) -> (i32, i32) {
    %c1_i32 = arith.constant 1 : i32
    %0 = arith.muli %arg0, %c1_i32 : i32
    %1 = arith.addi %0, %arg1 : i32
    %c0_i32 = arith.constant 0 : i32
    %c0_i32_0 = arith.constant 0 : i32
    return %c0_i32, %1 : i32, i32
  }
  func.func @transform_2(%arg0: i32, %arg1: i32) -> (i32, i32, i32) {
    %c0_i32 = arith.constant 0 : i32
    %c0_i32_0 = arith.constant 0 : i32
    %c0_i32_1 = arith.constant 0 : i32
    return %arg0, %c0_i32, %c0_i32_0 : i32, i32, i32
  }
  func.func @transform_3(%arg0: i32, %arg1: i32) -> (i32, i32, i32) {
    %c0_i32 = arith.constant 0 : i32
    %c0_i32_0 = arith.constant 0 : i32
    %c0_i32_1 = arith.constant 0 : i32
    return %arg0, %c0_i32, %c0_i32_0 : i32, i32, i32
  }
  func.func @transform_4(%arg0: i32, %arg1: i32) -> (i32, i32, i32) {
    %c0_i32 = arith.constant 0 : i32
    %c0_i32_0 = arith.constant 0 : i32
    %c0_i32_1 = arith.constant 0 : i32
    return %arg0, %c0_i32, %c0_i32_0 : i32, i32, i32
  }
  func.func @transform_5(%arg0: i32, %arg1: i32) -> (i32, i32, i32) {
    %c0_i32 = arith.constant 0 : i32
    %c0_i32_0 = arith.constant 0 : i32
    %c0_i32_1 = arith.constant 0 : i32
    return %arg0, %c0_i32, %c0_i32_0 : i32, i32, i32
  }
}

</mosaic_0001>

<bundles_post_ra>
// kernel: tpu_custom_call.1
= control target key start
LH: loop header
LB: loop body
LE: loop exit
PB: predicated region body
PF: predicated region fallthrough
CT: control target
= control target key end

     0   :  { %11 = vsyncpa [#allocation3], 0  ;;  %s353_s0 = inlined_call_operand.hbm [shape: f32[5,8], index: 0, kind: input, shape index: {}]   ;;  %s354_s1 = inlined_call_operand.hbm [shape: s32[1,8], index: 1, kind: input, shape index: {}]   ;;  %s355_s2 = inlined_call_operand.vmem [shape: f32[1,5,1], index: 2, kind: output, shape index: {0}]   ;;  %s356_s3 = inlined_call_operand.vmem [shape: f32[1,5,1], index: 3, kind: output, shape index: {1}]   ;;  %s357_s4 = inlined_call_operand.vmem [shape: f32[1,5,1], index: 4, kind: output, shape index: {2}]   ;;  %s358_s5 = inlined_call_operand.vmem [shape: f32[1,5,1], index: 5, kind: output, shape index: {3}]  }
   0x1   :  { %s21_s20 = sshll.u32 %s353_s0, 4  ;;  %s22_s20 = int_to_ptr.hbm [resolvable:$true] %s21_s20 }
   0x2   :  { %12 = vsyncpa [#allocation5], 0  ;;  %s246_s21 = smov [#allocation2]   ;;  %s34_s25 = sshll.u32 %s354_s1, 4  ;;  %s35_s25 = int_to_ptr.hbm [resolvable:$true] %s34_s25 }
   0x3   :  { %s23_s22 = sshll.u32 %s246_s21, 4  ;;  %s247_s26 = smov [#allocation4]   ;;  %s24_s22 = int_to_ptr.vmem [resolvable:$true] %s23_s22 }
   0x4   :  { %26 = dma.hbm_to_vmem [thread:$0]  %s22_s20, 128, %s24_s22, [#allocation3]  }
   0x5   :  { %s36_s27 = sshll.u32 %s247_s26, 4  ;;  %s37_s27 = int_to_ptr.vmem [resolvable:$true] %s36_s27 }
   0x6   :  { %39 = dma.hbm_to_vmem [thread:$0]  %s35_s25, 16, %s37_s27, [#allocation5]  }
   0x7   :  { %242 = dma.done.wait [#allocation3], 128  }
   0x8   :  { %243 = vsyncadd [#allocation3], 4294967168 }
   0x9   :  { %244 = dma.done.wait [#allocation5], 16  }
   0xa   :  { %245 = vsyncadd [#allocation5], 4294967280  ;;  %vm54_vm0 = vcmask 4096   ;;  %v61_v0 = vlaneseq  ;;  %v248_v1 = vmov 0.0   ;;  %vm98_vm1 = vcmask 61440  }
   0xb   :  { %55 = vst.msk [vmem:[%s355_s2] sm:$0x1f] %vm54_vm0, %v248_v1  ;;  %v303_v3 = vld [vmem:[#allocation4] ss:$0 sm:$0xff]  ;;  %v59_v4 = vld [vmem:[#allocation2] sm:$0x1f] }
   0xc   :  { %56 = vst.msk [vmem:[%s356_s3] sm:$0x1f] %vm54_vm0, %v248_v1  ;;  %v301_v2 = vshrl.u32 %v61_v0, 7  ;;  %v66_v5 = vand.u32 2147483647, %v59_v4  ;;  %v105_v6 = vsel %vm98_vm1, %v59_v4, -inf }
   0xd   :  { %57 = vst.msk [vmem:[%s357_s4] sm:$0x1f] %vm54_vm0, %v248_v1  ;;  %v106_v7 = vrot.slane %v105_v6, 4  ;;  %vm83_vm3 = vcmp.ge.f32.partialorder %v59_v4, 0.0  ;;  %v71_v28 = vmax.f32 %v59_v4, 0.0 }
   0xe   :  { %58 = vst.msk [vmem:[%s358_s5] sm:$0x1f] %vm54_vm0, %v248_v1  ;;  %vm64_vm2 = vcmp.eq.s32.totalorder %v301_v2, %v303_v3  ;;  %v67_v9 = vsub.f32 0.0, %v66_v5  ;;  %v150_v53 = vsub.s32 %v301_v2, %v303_v3 }
   0xf   :  { %v65_v8 = vsel %vm64_vm2, 1.0, %v248_v1  ;;  %v107_v11 = vmax.f32 %v105_v6, %v106_v7  ;;  %v70_v31 = vsel %vm64_vm2, %v59_v4, 0.0 }
  0x10   :  { %v145_v10 = vsel %vm98_vm1, %v65_v8, 0.0  ;;  %v68_v12 = vmul.f32 1.442695, %v67_v9  ;;  %v72_v38 = vsub.f32 %v70_v31, %v71_v28  ;;  %v151_v5 = vcvt.s32.f32 %v150_v53 }
  0x11   :  { %146 = vadd.xlane.f32.xlu1 %v145_v10  ;;  %v108_v13 = vrot.slane %v107_v11, 2 }
  0x12   :  { %182 = vpow2.f32 %v68_v12  ;;  %v153_v8 = vmul.f32 %v151_v5, %v151_v5 }
  0x13   :  { %v109_v14 = vmax.f32 %v107_v11, %v108_v13  ;;  %v144_v11 = vld [vmem:[%s356_s3] sm:$0x1f] }
  0x15   :  { %v110_v15 = vrot.slane %v109_v14, 1 }
  0x17   :  { %v111_v16 = vmax.f32 %v109_v14, %v110_v15  ;;  %v97_v14 = vld [vmem:[%s358_s5] sm:$0x1f] }
  0x18   :  { %v183_v17 = vpop.eup %182 }
  0x19   :  { %v73_v18 = vadd.f32 1.0, %v183_v17  ;;  %v112_v19 = vsub.f32 %v59_v4, %v111_v16  ;;  %v76_v20 = vmul.f32 -0.5, %v183_v17  ;;  %v79_v24 = vand.u32 2147483647, %v183_v17 }
  0x1a   :  { %v84_v26 = vsel %vm83_vm3, 1.0, %v183_v17  ;;  %v85_v27 = vsel %vm83_vm3, %v183_v17, 1.0 }
  0x1b   :  { %184 = vlog2.f32 %v73_v18  ;;  %v113_v21 = vmul.f32 1.442695, %v112_v19  ;;  %v77_v22 = vadd.f32 1.0, %v76_v20  ;;  %vm80_vm4 = vcmp.lt.f32.partialorder %v79_v24, 0.0004427343 }
  0x1c   :  { %186 = vrcp.f32 %v73_v18  ;;  %v86_v36 = vsel %vm64_vm2, %v84_v26, %v85_v27 }
  0x1d   :  { %188 = vpow2.f32 %v113_v21  ;;  %v78_v33 = vmul.f32 %v183_v17, %v77_v22  ;;  %v138_v17 = vld [vmem:[%s355_s2] sm:$0x1f] }
  0x21   :  { %v185_v23 = vpop.eup %184 }
  0x22   :  { %v187_v25 = vpop.eup %186  ;;  %v75_v32 = vmul.f32 0.6931472, %v185_v23 }
  0x23   :  { %v89_v29 = vmul.f32 %v187_v25, %v73_v18  ;;  %v189_v30 = vpop.eup %188  ;;  %v152_v18 = vld [vmem:[%s357_s4] sm:$0x1f] }
  0x24   :  { %v115_v35 = vsel %vm98_vm1, %v189_v30, 0.0  ;;  %v81_v40 = vsel %vm80_vm4, %v78_v33, %v75_v32 }
  0x25   :  { %v90_v34 = vsub.f32 2.0, %v89_v29  ;;  %v116_v37 = vrot.slane %v115_v35, 4  ;;  %v82_v44 = vsub.f32 %v72_v38, %v81_v40 }
  0x27   :  { %v91_v39 = vmul.f32 %v187_v25, %v90_v34  ;;  %v117_v41 = vadd.f32 %v116_v37, %v115_v35 }
  0x29   :  { %v92_v42 = vmul.f32 %v91_v39, %v86_v36  ;;  %v118_v43 = vrot.slane %v117_v41, 2 }
  0x2b   :  { %v93_v45 = vsub.f32 1.0, %v92_v42  ;;  %v119_v46 = vadd.f32 %v118_v43, %v117_v41 }
  0x2d   :  { %v94_v47 = vmul.f32 %v93_v45, %v93_v45  ;;  %v120_v48 = vrot.slane %v119_v46, 1 }
  0x2f   :  { %v95_v49 = vmul.f32 %v94_v47, %v82_v44  ;;  %v121_v50 = vadd.f32 %v120_v48, %v119_v46 }
  0x31   :  { %v96_v51 = vsub.f32 0.0, %v95_v49  ;;  %190 = vrcp.f32 %v121_v50 }
  0x33   :  { %v99_v52 = vsel %vm98_vm1, %v96_v51, 0.0 }
  0x34   :  { %100 = vadd.xlane.f32.xlu0 %v99_v52 }
  0x37   :  { %v191_v54 = vpop.eup %190 }
  0x38   :  { %v123_v55 = vmul.f32 %v191_v54, %v189_v30 }
  0x3a   :  { %v124_v56 = vmul.f32 %v123_v55, %v123_v55 }
  0x3c   :  { %v125_v57 = vsel %vm98_vm1, %v124_v56, 0.0 }
  0x3d   :  { %v126_v58 = vrot.slane %v125_v57, 4 }
  0x3f   :  { %v127_v59 = vadd.f32 %v126_v58, %v125_v57 }
  0x41   :  { %v128_v60 = vrot.slane %v127_v59, 2 }
  0x43   :  { %v129_v61 = vadd.f32 %v128_v60, %v127_v59 }
  0x45   :  { %v130_v62 = vrot.slane %v129_v61, 1 }
  0x47   :  { %v131_v63 = vadd.f32 %v130_v62, %v129_v61 }
  0x49   :  { %v132_v0 = vadd.f32 1e-15, %v131_v63 }
  0x4b   :  { %192 = vrcp.f32 %v132_v0 }
  0x51   :  { %v193_v1 = vpop.eup %192 }
  0x52   :  { %v134_v4 = vmul.f32 %v193_v1, %v132_v0 }
  0x54   :  { %v135_v6 = vsub.f32 2.0, %v134_v4 }
  0x56   :  { %v136_v7 = vmul.f32 %v193_v1, %v135_v6 }
  0x58   :  { %v137_v2 = vmul.f32 %v136_v7, %v124_v56 }
  0x5a   :  { %v154_v3 = vmul.f32 %v153_v8, %v137_v2  ;;  %v139_v9 = vsel %vm98_vm1, %v137_v2, 0.0 }
  0x5b   :  { %140 = vadd.xlane.f32.xlu0 %v139_v9 }
  0x5c   :  { %v155_v10 = vsel %vm98_vm1, %v154_v3, 0.0 }
  0x5d   :  { %156 = vadd.xlane.f32.xlu1 %v155_v10 }
  0x84   :  { %v147_v12 = vpop.xlane.xlu1 %146 }
  0x85   :  { %v148_v13 = vadd.f32 %v147_v12, %v144_v11 }
  0x87   :  { %149 = vst.msk [vmem:[%s356_s3] sm:$0x1f] %vm54_vm0, %v148_v13 }
  0xa7   :  { %v101_v15 = vpop.xlane.xlu0 %100 }
  0xa8   :  { %v102_v16 = vadd.f32 %v101_v15, %v97_v14 }
  0xaa   :  { %104 = vst.msk [vmem:[%s358_s5] sm:$0x1f] %vm54_vm0, %v102_v16 }
  0xce   :  { %v141_v19 = vpop.xlane.xlu0 %140 }
  0xcf   :  { %v142_v20 = vadd.f32 %v141_v19, %v138_v17 }
  0xd0   :  { %v157_v21 = vpop.xlane.xlu1 %156 }
  0xd1   :  { %v158_v22 = vadd.f32 %v157_v21, %v152_v18  ;;  %143 = vst.msk [vmem:[%s355_s2] sm:$0x1f] %vm54_vm0, %v142_v20 }
  0xd3   :  { %159 = vst.msk [vmem:[%s357_s4] sm:$0x1f] %vm54_vm0, %v158_v22 }
  0xd4   :  { %176 = vsyncpa [#allocation3], 1 }
  0xd5   :  { %177 = vsyncpa [#allocation5], 1 }

</bundles_post_ra>
